<compile_context>
chip_gen: v7x
topology: tpu7x:2x2x1
jax: 0.10.0
libtpu: 0.0.40
codegen_flags: <defaults>
</compile_context>

<pallas_src>
import functools

import jax
import jax.numpy as jnp
from jax import lax
from jax.experimental import pallas as pl
from jax.experimental.pallas import tpu as pltpu

_LANE = 128
_SUBLANE = 8


def _round_up(n, m):
    return ((n + m - 1) // m) * m


def _pad2d(a, rows, cols):
    r, c = a.shape
    return jnp.pad(a, ((0, rows - r), (0, cols - c)))


def refinement_mlp_kernel(x_ref, w1_ref, b1_ref, w2_ref, b2_ref,
                          wr_ref, br_ref, w3_ref, b3_ref, out_ref,
                          *, max_iter, mm_dtype):
    def mm(a, w_ref):
        # Low-precision (bf16) MXU inputs, f32 accumulation.
        return jnp.dot(a.astype(mm_dtype), w_ref[...],
                       preferred_element_type=jnp.float32)

    x = x_ref[...]

    # h = relu(fc1(x))
    h = jnp.maximum(mm(x, w1_ref) + b1_ref[...], 0.0)
    # xp = relu(fc2(h))
    xp = jnp.maximum(mm(h, w2_ref) + b2_ref[...], 0.0)

    # Hoist loop invariants: refiner bias broadcast done once, weight already
    # resident in mm_dtype (cast happened in the wrapper, once, off-kernel).
    br = jnp.broadcast_to(br_ref[...], xp.shape)

    def body(_, xp_c):
        refined = jnp.maximum(mm(xp_c, wr_ref) + br, 0.0)
        return xp_c + refined

    # Static trip count -> unroll so the scheduler can overlap MXU and VPU work
    # across refinement iterations.
    xp = lax.fori_loop(0, max_iter, body, xp, unroll=True)

    # logits = fc3(xp)  (lane-dense, unmasked f32 store)
    out_ref[...] = mm(xp, w3_ref) + b3_ref[...]


def refinement_mlp(x, params, *, max_iter=3, use_bf16=True, block_batch=256):
    """x: (B, in).  params: (w1, b1, w2, b2, wr, br, w3, b3) with weights
    stored transposed as (fan_in, fan_out) and biases as (fan_out,)."""
    w1, b1, w2, b2, wr, br, w3, b3 = params
    B, IN = x.shape
    H = w1.shape[1]
    OUT = w3.shape[1]

    mm_dtype = jnp.bfloat16 if use_bf16 else jnp.float32

    # Lane-dense padding of feature dims; sublane-aligned batch tiling.
    IN_p = _round_up(IN, _LANE)
    H_p = _round_up(H, _LANE)
    OUT_p = _round_up(OUT, _LANE)
    B8 = _round_up(B, _SUBLANE)
    block_b = B8 if B8 <= block_batch else block_batch
    B_p = _round_up(B8, block_b)

    x_p = _pad2d(x.astype(jnp.float32), B_p, IN_p)
    # Weights: pad then cast to the MXU dtype once (outside the kernel).
    w1_p = _pad2d(w1, IN_p, H_p).astype(mm_dtype)
    w2_p = _pad2d(w2, H_p, H_p).astype(mm_dtype)
    wr_p = _pad2d(wr, H_p, H_p).astype(mm_dtype)
    w3_p = _pad2d(w3, H_p, OUT_p).astype(mm_dtype)
    # Biases stay f32 (added after f32 accumulation).
    b1_p = _pad2d(b1.reshape(1, -1).astype(jnp.float32), 1, H_p)
    b2_p = _pad2d(b2.reshape(1, -1).astype(jnp.float32), 1, H_p)
    br_p = _pad2d(br.reshape(1, -1).astype(jnp.float32), 1, H_p)
    b3_p = _pad2d(b3.reshape(1, -1).astype(jnp.float32), 1, OUT_p)

    def resident(a):
        # Whole array as one block, same block index for every grid step:
        # weights/biases are DMA'd once and stay resident in VMEM.
        return pl.BlockSpec(a.shape, lambda i: (0, 0))

    grid = (B_p // block_b,)
    in_specs = [
        pl.BlockSpec((block_b, IN_p), lambda i: (i, 0)),
        resident(w1_p), resident(b1_p),
        resident(w2_p), resident(b2_p),
        resident(wr_p), resident(br_p),
        resident(w3_p), resident(b3_p),
    ]
    out_specs = pl.BlockSpec((block_b, OUT_p), lambda i: (i, 0))

    kernel = functools.partial(refinement_mlp_kernel,
                               max_iter=max_iter, mm_dtype=mm_dtype)

    out_p = pl.pallas_call(
        kernel,
        out_shape=jax.ShapeDtypeStruct((B_p, OUT_p), jnp.float32),
        grid_spec=pltpu.PrefetchScalarGridSpec(
            num_scalar_prefetch=0,
            grid=grid,
            in_specs=in_specs,
            out_specs=out_specs,
        ),
        compiler_params=pltpu.CompilerParams(
            # Batch tiles are independent work -> parallel (megacore on v7x).
            dimension_semantics=("parallel",),
        ),
    )(x_p, w1_p, b1_p, w2_p, b2_p, wr_p, br_p, w3_p, b3_p)

    return out_p[:B, :OUT]


def reference_forward(x, params, *, max_iter=3, use_bf16=True):
    """Pure-JAX re-implementation of the PyTorch forward with the same dot
    precision as the kernel (isolates the Pallas lowering)."""
    w1, b1, w2, b2, wr, br, w3, b3 = params
    mm_dtype = jnp.bfloat16 if use_bf16 else jnp.float32

    def mm(a, w):
        return jnp.dot(a.astype(mm_dtype), w.astype(mm_dtype),
                       preferred_element_type=jnp.float32)

    h = jnp.maximum(mm(x, w1) + b1, 0.0)
    xp = jnp.maximum(mm(h, w2) + b2, 0.0)
    for _ in range(max_iter):
        xp = xp + jnp.maximum(mm(xp, wr) + br, 0.0)
    return mm(xp, w3) + b3


if __name__ == "__main__":
    B, IN_SIZE, HIDDEN, OUT_SIZE = 8, 16, 32, 8
    MAX_ITER = 3

    key = jax.random.PRNGKey(0)
    ks = jax.random.split(key, 9)

    def linear_params(kw, kb, fan_in, fan_out):
        # PyTorch-style uniform(-1/sqrt(fan_in), 1/sqrt(fan_in)) init.
        bound = 1.0 / float(fan_in) ** 0.5
        w = jax.random.uniform(kw, (fan_in, fan_out), jnp.float32, -bound, bound)
        b = jax.random.uniform(kb, (fan_out,), jnp.float32, -bound, bound)
        return w, b

    w1, b1 = linear_params(ks[0], ks[1], IN_SIZE, HIDDEN)
    w2, b2 = linear_params(ks[2], ks[3], HIDDEN, HIDDEN)
    wr, br = linear_params(ks[4], ks[5], HIDDEN, HIDDEN)   # refiner
    w3, b3 = linear_params(ks[6], ks[7], HIDDEN, OUT_SIZE)
    params = (w1, b1, w2, b2, wr, br, w3, b3)

    x = jax.random.normal(ks[8], (B, IN_SIZE), jnp.float32)

    out = refinement_mlp(x, params, max_iter=MAX_ITER, use_bf16=True)
    out = jax.block_until_ready(out)

    ref = reference_forward(x, params, max_iter=MAX_ITER, use_bf16=True)
    assert out.shape == (B, OUT_SIZE)
    assert jnp.allclose(out, ref, rtol=2e-3, atol=2e-3), (out, ref)
    print("KERNEL_OK")
</pallas_src>

<mosaic_0001>
module attributes {stable_mosaic.version = 11 : i64} {
  func.func @refinement_mlp_kernel(%arg0: i32, %arg1: memref<8x128xf32, #tpu.memory_space<vmem>>, %arg2: memref<128x128xbf16, #tpu.memory_space<vmem>>, %arg3: memref<1x128xf32, #tpu.memory_space<vmem>>, %arg4: memref<128x128xbf16, #tpu.memory_space<vmem>>, %arg5: memref<1x128xf32, #tpu.memory_space<vmem>>, %arg6: memref<128x128xbf16, #tpu.memory_space<vmem>>, %arg7: memref<1x128xf32, #tpu.memory_space<vmem>>, %arg8: memref<128x128xbf16, #tpu.memory_space<vmem>>, %arg9: memref<1x128xf32, #tpu.memory_space<vmem>>, %arg10: memref<8x128xf32, #tpu.memory_space<vmem>>) attributes {dimension_semantics = [#tpu.dimension_semantics<parallel>], iteration_bounds = array<i64: 1>, scalar_prefetch = 0 : i64, scratch_operands = 0 : i64, tpu.core_type = #tpu.core_type<tc>, window_params = [{transform_indices = @transform_0, window_bounds = array<i64: 8, 128>}, {pipeline_mode = #tpu.pipeline_mode<synchronous>, transform_indices = @transform_1, window_bounds = array<i64: 128, 128>}, {pipeline_mode = #tpu.pipeline_mode<synchronous>, transform_indices = @transform_2, window_bounds = array<i64: 1, 128>}, {pipeline_mode = #tpu.pipeline_mode<synchronous>, transform_indices = @transform_3, window_bounds = array<i64: 128, 128>}, {pipeline_mode = #tpu.pipeline_mode<synchronous>, transform_indices = @transform_4, window_bounds = array<i64: 1, 128>}, {pipeline_mode = #tpu.pipeline_mode<synchronous>, transform_indices = @transform_5, window_bounds = array<i64: 128, 128>}, {pipeline_mode = #tpu.pipeline_mode<synchronous>, transform_indices = @transform_6, window_bounds = array<i64: 1, 128>}, {pipeline_mode = #tpu.pipeline_mode<synchronous>, transform_indices = @transform_7, window_bounds = array<i64: 128, 128>}, {pipeline_mode = #tpu.pipeline_mode<synchronous>, transform_indices = @transform_8, window_bounds = array<i64: 1, 128>}, {transform_indices = @transform_9, window_bounds = array<i64: 8, 128>}]} {
    %c0 = arith.constant 0 : index
    %c0_0 = arith.constant 0 : index
    %0 = vector.load %arg1[%c0, %c0_0] : memref<8x128xf32, #tpu.memory_space<vmem>>, vector<8x128xf32>
    %1 = arith.truncf %0 : vector<8x128xf32> to vector<8x128xbf16>
    %c0_1 = arith.constant 0 : index
    %c0_2 = arith.constant 0 : index
    %2 = vector.load %arg2[%c0_1, %c0_2] : memref<128x128xbf16, #tpu.memory_space<vmem>>, vector<128x128xbf16>
    %cst = arith.constant dense<0.000000e+00> : vector<8x128xf32>
    %3 = tpu.matmul %1, %2, %cst {dimension_numbers = #tpu.dot_dimension_numbers<[1], [0], [0], [1], [0, 0, 1, 1], [], []>} : vector<8x128xbf16>, vector<128x128xbf16>, vector<8x128xf32> -> vector<8x128xf32>
    %c0_3 = arith.constant 0 : index
    %c0_4 = arith.constant 0 : index
    %4 = vector.load %arg3[%c0_3, %c0_4] : memref<1x128xf32, #tpu.memory_space<vmem>>, vector<1x128xf32>
    %5 = vector.broadcast %4 : vector<1x128xf32> to vector<8x128xf32>
    %6 = arith.addf %3, %5 : vector<8x128xf32>
    %cst_5 = arith.constant 0.000000e+00 : f32
    %7 = vector.broadcast %cst_5 : f32 to vector<8x128xf32>
    %8 = arith.maximumf %6, %7 : vector<8x128xf32>
    %9 = arith.truncf %8 : vector<8x128xf32> to vector<8x128xbf16>
    %c0_6 = arith.constant 0 : index
    %c0_7 = arith.constant 0 : index
    %10 = vector.load %arg4[%c0_6, %c0_7] : memref<128x128xbf16, #tpu.memory_space<vmem>>, vector<128x128xbf16>
    %cst_8 = arith.constant dense<0.000000e+00> : vector<8x128xf32>
    %11 = tpu.matmul %9, %10, %cst_8 {dimension_numbers = #tpu.dot_dimension_numbers<[1], [0], [0], [1], [0, 0, 1, 1], [], []>} : vector<8x128xbf16>, vector<128x128xbf16>, vector<8x128xf32> -> vector<8x128xf32>
    %c0_9 = arith.constant 0 : index
    %c0_10 = arith.constant 0 : index
    %12 = vector.load %arg5[%c0_9, %c0_10] : memref<1x128xf32, #tpu.memory_space<vmem>>, vector<1x128xf32>
    %13 = vector.broadcast %12 : vector<1x128xf32> to vector<8x128xf32>
    %14 = arith.addf %11, %13 : vector<8x128xf32>
    %cst_11 = arith.constant 0.000000e+00 : f32
    %15 = vector.broadcast %cst_11 : f32 to vector<8x128xf32>
    %16 = arith.maximumf %14, %15 : vector<8x128xf32>
    %c0_12 = arith.constant 0 : index
    %c0_13 = arith.constant 0 : index
    %17 = vector.load %arg7[%c0_12, %c0_13] : memref<1x128xf32, #tpu.memory_space<vmem>>, vector<1x128xf32>
    %18 = vector.shape_cast %17 : vector<1x128xf32> to vector<1x128xf32>
    %19 = vector.broadcast %18 : vector<1x128xf32> to vector<8x128xf32>
    %c0_i32 = arith.constant 0 : i32
    %20 = arith.truncf %16 : vector<8x128xf32> to vector<8x128xbf16>
    %c0_14 = arith.constant 0 : index
    %c0_15 = arith.constant 0 : index
    %21 = vector.load %arg6[%c0_14, %c0_15] : memref<128x128xbf16, #tpu.memory_space<vmem>>, vector<128x128xbf16>
    %cst_16 = arith.constant dense<0.000000e+00> : vector<8x128xf32>
    %22 = tpu.matmul %20, %21, %cst_16 {dimension_numbers = #tpu.dot_dimension_numbers<[1], [0], [0], [1], [0, 0, 1, 1], [], []>} : vector<8x128xbf16>, vector<128x128xbf16>, vector<8x128xf32> -> vector<8x128xf32>
    %23 = arith.addf %22, %19 : vector<8x128xf32>
    %cst_17 = arith.constant 0.000000e+00 : f32
    %24 = vector.broadcast %cst_17 : f32 to vector<8x128xf32>
    %25 = arith.maximumf %23, %24 : vector<8x128xf32>
    %26 = arith.addf %16, %25 : vector<8x128xf32>
    %c1_i32 = arith.constant 1 : i32
    %27 = arith.truncf %26 : vector<8x128xf32> to vector<8x128xbf16>
    %c0_18 = arith.constant 0 : index
    %c0_19 = arith.constant 0 : index
    %28 = vector.load %arg6[%c0_18, %c0_19] : memref<128x128xbf16, #tpu.memory_space<vmem>>, vector<128x128xbf16>
    %cst_20 = arith.constant dense<0.000000e+00> : vector<8x128xf32>
    %29 = tpu.matmul %27, %28, %cst_20 {dimension_numbers = #tpu.dot_dimension_numbers<[1], [0], [0], [1], [0, 0, 1, 1], [], []>} : vector<8x128xbf16>, vector<128x128xbf16>, vector<8x128xf32> -> vector<8x128xf32>
    %30 = arith.addf %29, %19 : vector<8x128xf32>
    %cst_21 = arith.constant 0.000000e+00 : f32
    %31 = vector.broadcast %cst_21 : f32 to vector<8x128xf32>
    %32 = arith.maximumf %30, %31 : vector<8x128xf32>
    %33 = arith.addf %26, %32 : vector<8x128xf32>
    %c2_i32 = arith.constant 2 : i32
    %34 = arith.truncf %33 : vector<8x128xf32> to vector<8x128xbf16>
    %c0_22 = arith.constant 0 : index
    %c0_23 = arith.constant 0 : index
    %35 = vector.load %arg6[%c0_22, %c0_23] : memref<128x128xbf16, #tpu.memory_space<vmem>>, vector<128x128xbf16>
    %cst_24 = arith.constant dense<0.000000e+00> : vector<8x128xf32>
    %36 = tpu.matmul %34, %35, %cst_24 {dimension_numbers = #tpu.dot_dimension_numbers<[1], [0], [0], [1], [0, 0, 1, 1], [], []>} : vector<8x128xbf16>, vector<128x128xbf16>, vector<8x128xf32> -> vector<8x128xf32>
    %37 = arith.addf %36, %19 : vector<8x128xf32>
    %cst_25 = arith.constant 0.000000e+00 : f32
    %38 = vector.broadcast %cst_25 : f32 to vector<8x128xf32>
    %39 = arith.maximumf %37, %38 : vector<8x128xf32>
    %40 = arith.addf %33, %39 : vector<8x128xf32>
    %41 = arith.truncf %40 : vector<8x128xf32> to vector<8x128xbf16>
    %c0_26 = arith.constant 0 : index
    %c0_27 = arith.constant 0 : index
    %42 = vector.load %arg8[%c0_26, %c0_27] : memref<128x128xbf16, #tpu.memory_space<vmem>>, vector<128x128xbf16>
    %cst_28 = arith.constant dense<0.000000e+00> : vector<8x128xf32>
    %43 = tpu.matmul %41, %42, %cst_28 {dimension_numbers = #tpu.dot_dimension_numbers<[1], [0], [0], [1], [0, 0, 1, 1], [], []>} : vector<8x128xbf16>, vector<128x128xbf16>, vector<8x128xf32> -> vector<8x128xf32>
    %c0_29 = arith.constant 0 : index
    %c0_30 = arith.constant 0 : index
    %44 = vector.load %arg9[%c0_29, %c0_30] : memref<1x128xf32, #tpu.memory_space<vmem>>, vector<1x128xf32>
    %45 = vector.broadcast %44 : vector<1x128xf32> to vector<8x128xf32>
    %46 = arith.addf %43, %45 : vector<8x128xf32>
    %c0_31 = arith.constant 0 : index
    %c0_32 = arith.constant 0 : index
    %47 = vector.load %arg10[%c0_31, %c0_32] : memref<8x128xf32, #tpu.memory_space<vmem>>, vector<8x128xf32>
    tpu.vector_store %arg10[%c0_31, %c0_32], %46 {strides = array<i32>} : memref<8x128xf32, #tpu.memory_space<vmem>>, vector<8x128xf32>,
    return
  }
  func.func @transform_0(%arg0: i32) -> (i32, i32) {
    %c0_i32 = arith.constant 0 : i32
    %c0_i32_0 = arith.constant 0 : i32
    return %arg0, %c0_i32 : i32, i32
  }
  func.func @transform_1(%arg0: i32) -> (i32, i32) {
    %c0_i32 = arith.constant 0 : i32
    %c0_i32_0 = arith.constant 0 : i32
    %c0_i32_1 = arith.constant 0 : i32
    return %c0_i32, %c0_i32_0 : i32, i32
  }
  func.func @transform_2(%arg0: i32) -> (i32, i32) {
    %c0_i32 = arith.constant 0 : i32
    %c0_i32_0 = arith.constant 0 : i32
    %c0_i32_1 = arith.constant 0 : i32
    return %c0_i32, %c0_i32_0 : i32, i32
  }
  func.func @transform_3(%arg0: i32) -> (i32, i32) {
    %c0_i32 = arith.constant 0 : i32
    %c0_i32_0 = arith.constant 0 : i32
    %c0_i32_1 = arith.constant 0 : i32
    return %c0_i32, %c0_i32_0 : i32, i32
  }
  func.func @transform_4(%arg0: i32) -> (i32, i32) {
    %c0_i32 = arith.constant 0 : i32
    %c0_i32_0 = arith.constant 0 : i32
    %c0_i32_1 = arith.constant 0 : i32
    return %c0_i32, %c0_i32_0 : i32, i32
  }
  func.func @transform_5(%arg0: i32) -> (i32, i32) {
    %c0_i32 = arith.constant 0 : i32
    %c0_i32_0 = arith.constant 0 : i32
    %c0_i32_1 = arith.constant 0 : i32
    return %c0_i32, %c0_i32_0 : i32, i32
  }
  func.func @transform_6(%arg0: i32) -> (i32, i32) {
    %c0_i32 = arith.constant 0 : i32
    %c0_i32_0 = arith.constant 0 : i32
    %c0_i32_1 = arith.constant 0 : i32
    return %c0_i32, %c0_i32_0 : i32, i32
  }
  func.func @transform_7(%arg0: i32) -> (i32, i32) {
    %c0_i32 = arith.constant 0 : i32
    %c0_i32_0 = arith.constant 0 : i32
    %c0_i32_1 = arith.constant 0 : i32
    return %c0_i32, %c0_i32_0 : i32, i32
  }
  func.func @transform_8(%arg0: i32) -> (i32, i32) {
    %c0_i32 = arith.constant 0 : i32
    %c0_i32_0 = arith.constant 0 : i32
    %c0_i32_1 = arith.constant 0 : i32
    return %c0_i32, %c0_i32_0 : i32, i32
  }
  func.func @transform_9(%arg0: i32) -> (i32, i32) {
    %c0_i32 = arith.constant 0 : i32
    %c0_i32_0 = arith.constant 0 : i32
    return %arg0, %c0_i32 : i32, i32
  }
}

</mosaic_0001>

<bundles_post_ra>
// kernel: tpu_custom_call.1
= control target key start
LH: loop header
LB: loop body
LE: loop exit
PB: predicated region body
PF: predicated region fallthrough
CT: control target
= control target key end

     0   :  { %14 = vsyncpa [#allocation3], 0  ;;  %s1265_s0 = inlined_call_operand.hbm [shape: f32[8,128], index: 0, kind: input, shape index: {}]   ;;  %s1266_s1 = inlined_call_operand.hbm [shape: bf16[128,128], index: 1, kind: input, shape index: {}]   ;;  %s1267_s2 = inlined_call_operand.vmem [shape: f32[1,128], index: 2, kind: input, shape index: {}]   ;;  %s1268_s3 = inlined_call_operand.hbm [shape: bf16[128,128], index: 3, kind: input, shape index: {}]   ;;  %s1269_s4 = inlined_call_operand.vmem [shape: f32[1,128], index: 4, kind: input, shape index: {}]   ;;  %s1270_s5 = inlined_call_operand.hbm [shape: bf16[128,128], index: 5, kind: input, shape index: {}]   ;;  %s1271_s6 = inlined_call_operand.vmem [shape: f32[1,128], index: 6, kind: input, shape index: {}]   ;;  %s1272_s7 = inlined_call_operand.hbm [shape: bf16[128,128], index: 7, kind: input, shape index: {}]   ;;  %s1273_s8 = inlined_call_operand.vmem [shape: f32[1,128], index: 8, kind: input, shape index: {}]   ;;  %s1274_s9 = inlined_call_operand.hbm [shape: f32[8,128], index: 9, kind: output, shape index: {}]  }
   0x1   :  { %15 = vsyncpa [#allocation6], 0 }
   0x2   :  { %16 = vsyncpa [#allocation9], 0 }
   0x3   :  { %17 = vsyncpa [#allocation4], 0  ;;  %s1049_s30 = smov [#allocation5]   ;;  %s909_s13 = scalar_lea.hbm %s1266_s1, 1024 }
   0x4   :  { %s33_s10 = sshll.u32 %s1049_s30, 4  ;;  %p910_p0 = scmp.ne.s32.totalorder %s1266_s1, %s909_s13  ;;  %s34_s10 = int_to_ptr.vmem [resolvable:$true] %s33_s10 }
   0x5   :  { %p913_p1 = scmp.lt.u32.totalorder %s909_s13, %s1266_s1 }
   0x7   :  { %p915_p2 = pnand %p913_p1, %p910_p0 }
   0x9   :  { %918 = shalt.err (!%p915_p2)
}
   0xa   :  { %s919_s18 = scalar_lea.vmem %s34_s10, 1024  ;;  %p924_p4 = scmp.lt.s32.totalorder %s34_s10, %s34_s10 }
   0xb   :  { %p920_p3 = scmp.ne.s32.totalorder %s34_s10, %s919_s18  ;;  %p925_p5 = scmp.lt.s32.totalorder %s919_s18, %s919_s18 }
   0xd   :  { %p926_p6 = por %p925_p5, %p924_p4 }
   0xf   :  { %p927_p7 = pnand %p926_p6, %p920_p3 }
  0x11   :  { %930 = shalt.err (!%p927_p7)
}
  0x12   :  { %s1050_s19 = smov 64   ;;  %s1051_s20 = smov 4  }
  0x13   :  { %39 = dma.hbm_to_vmem [thread:$0]  %s1266_s1, 1024, %s34_s10, [#allocation6], %s1050_s19, %s1050_s19, %s1051_s20  }
  0x14   :  { %s1052_s23 = smov [#allocation8]   ;;  %s1053_s25 = smov [#allocation2]  }
  0x15   :  { %s61_s24 = sshll.u32 %s1052_s23, 4  ;;  %s24_s26 = sshll.u32 %s1053_s25, 4  ;;  %s62_s24 = int_to_ptr.vmem [resolvable:$true] %s61_s24  ;;  %s25_s26 = int_to_ptr.vmem [resolvable:$true] %s24_s26 }
  0x16   :  { %s931_s29 = scalar_lea.hbm %s1270_s5, 1024 }
  0x17   :  { %p932_p8 = scmp.ne.s32.totalorder %s1270_s5, %s931_s29  ;;  %p935_p9 = scmp.lt.u32.totalorder %s931_s29, %s1270_s5 }
  0x19   :  { %p937_p10 = pnand %p935_p9, %p932_p8 }
  0x1b   :  { %940 = shalt.err (!%p937_p10)
}
  0x1c   :  { %s941_s1 = scalar_lea.vmem %s62_s24, 1024  ;;  %p946_p12 = scmp.lt.s32.totalorder %s62_s24, %s62_s24 }
  0x1d   :  { %p942_p11 = scmp.ne.s32.totalorder %s62_s24, %s941_s1  ;;  %p947_p13 = scmp.lt.s32.totalorder %s941_s1, %s941_s1 }
  0x1f   :  { %p948_p0 = por %p947_p13, %p946_p12 }
  0x21   :  { %p949_p1 = pnand %p948_p0, %p942_p11 }
  0x23   :  { %952 = shalt.err (!%p949_p1)
}
  0x24   :  { %67 = dma.hbm_to_vmem [thread:$0]  %s1270_s5, 1024, %s62_s24, [#allocation9], %s1050_s19, %s1050_s19, %s1051_s20  }
  0x25   :  { %s953_s17 = scalar_lea.hbm %s1265_s0, 128 }
  0x26   :  { %p954_p2 = scmp.ne.s32.totalorder %s1265_s0, %s953_s17  ;;  %p957_p3 = scmp.lt.u32.totalorder %s953_s17, %s1265_s0 }
  0x28   :  { %p959_p4 = pnand %p957_p3, %p954_p2 }
  0x2a   :  { %962 = shalt.err (!%p959_p4)
}
  0x2b   :  { %s963_s25 = scalar_lea.vmem %s25_s26, 128  ;;  %p968_p6 = scmp.lt.s32.totalorder %s25_s26, %s25_s26 }
  0x2c   :  { %p964_p5 = scmp.ne.s32.totalorder %s25_s26, %s963_s25  ;;  %p969_p7 = scmp.lt.s32.totalorder %s963_s25, %s963_s25 }
  0x2e   :  { %p970_p8 = por %p969_p7, %p968_p6 }
  0x30   :  { %p971_p9 = pnand %p970_p8, %p964_p5 }
  0x32   :  { %974 = shalt.err (!%p971_p9)
}
  0x33   :  { %27 = dma.hbm_to_vmem [thread:$0]  %s1265_s0, 128, %s25_s26, [#allocation3]  }
  0x34   :  { %s1054_s27 = smov [#allocation7]   ;;  %s1055_s29 = smov [#allocation10]  }
  0x35   :  { %s47_s28 = sshll.u32 %s1054_s27, 4  ;;  %s75_s30 = sshll.u32 %s1055_s29, 4  ;;  %s48_s28 = int_to_ptr.vmem [resolvable:$true] %s47_s28  ;;  %s76_s30 = int_to_ptr.vmem [resolvable:$true] %s75_s30 }
  0x36   :  { %s975_s13 = scalar_lea.hbm %s1268_s3, 1024 }
  0x37   :  { %p976_p10 = scmp.ne.s32.totalorder %s1268_s3, %s975_s13  ;;  %p979_p11 = scmp.lt.u32.totalorder %s975_s13, %s1268_s3 }
  0x39   :  { %p981_p12 = pnand %p979_p11, %p976_p10 }
  0x3b   :  { %984 = shalt.err (!%p981_p12)
}
  0x3c   :  { %s985_s0 = scalar_lea.vmem %s48_s28, 1024  ;;  %p990_p0 = scmp.lt.s32.totalorder %s48_s28, %s48_s28 }
  0x3d   :  { %p986_p13 = scmp.ne.s32.totalorder %s48_s28, %s985_s0  ;;  %p991_p1 = scmp.lt.s32.totalorder %s985_s0, %s985_s0 }
  0x3f   :  { %p992_p2 = por %p991_p1, %p990_p0 }
  0x41   :  { %p993_p3 = pnand %p992_p2, %p986_p13 }
  0x43   :  { %996 = shalt.err (!%p993_p3)
}
  0x44   :  { %53 = dma.hbm_to_vmem [thread:$0]  %s1268_s3, 1024, %s48_s28, [#allocation6], %s1050_s19, %s1050_s19, %s1051_s20  }
  0x45   :  { %s997_s21 = scalar_lea.hbm %s1272_s7, 1024 }
  0x46   :  { %p998_p4 = scmp.ne.s32.totalorder %s1272_s7, %s997_s21  ;;  %p1001_p5 = scmp.lt.u32.totalorder %s997_s21, %s1272_s7 }
  0x48   :  { %p1003_p6 = pnand %p1001_p5, %p998_p4 }
  0x4a   :  { %1006 = shalt.err (!%p1003_p6)
}
  0x4b   :  { %s1007_s24 = scalar_lea.vmem %s76_s30, 1024  ;;  %p1012_p8 = scmp.lt.s32.totalorder %s76_s30, %s76_s30 }
  0x4c   :  { %p1008_p7 = scmp.ne.s32.totalorder %s76_s30, %s1007_s24  ;;  %p1013_p9 = scmp.lt.s32.totalorder %s1007_s24, %s1007_s24 }
  0x4e   :  { %p1014_p10 = por %p1013_p9, %p1012_p8 }
  0x50   :  { %p1015_p11 = pnand %p1014_p10, %p1008_p7 }
  0x52   :  { %1018 = shalt.err (!%p1015_p11)
}
  0x53   :  { %81 = dma.hbm_to_vmem [thread:$0]  %s1272_s7, 1024, %s76_s30, [#allocation9], %s1050_s19, %s1050_s19, %s1051_s20  }
  0x54   :  { %1041 = dma.done.wait [#allocation3], 128  }
  0x55   :  { %1042 = vsyncadd [#allocation3], 4294967168 }
  0x56   :  { %1043 = dma.done.wait [#allocation6], 2048  }
  0x57   :  { %1044 = vsyncadd [#allocation6], 4294965248 }
  0x58   :  { %1045 = dma.done.wait [#allocation9], 2048  }
  0x59   :  { %1046 = vsyncadd [#allocation9], 4294965248  ;;  %v1056_v0 = vmov 0.0   ;;  %vm1057_vm0 = vmmov 0   ;;  %v877_v1 = vld [vmem:[#allocation5] sm:$0xff]   ;;  %v878_v2 = vld [vmem:[#allocation5 + $0x8] sm:$0xff]  }
  0x5a   :  { %747 = vmatprep.subr.bf16.mxu0 %v1056_v0  ;;  %763 = vmatprep.mubr.msk.bf16.mxu0 %vm1057_vm0, %v1056_v0  ;;  %v879_v3 = vld [vmem:[#allocation5 + $0x10] sm:$0xff]   ;;  %v885_v4 = vld [vmem:[#allocation7] sm:$0xff]   ;;  %v880_v5 = vld [vmem:[#allocation5 + $0x18] sm:$0xff]   ;;  %s1058_s30 = smov [#allocation11]  }
  0x5b   :  { %767 = vmatprep.subr.bf16.mxu1 %v1056_v0  ;;  %783 = vmatprep.mubr.msk.bf16.mxu1 %vm1057_vm0, %v1056_v0  ;;  %v886_v6 = vld [vmem:[#allocation7 + $0x8] sm:$0xff]   ;;  %v881_v7 = vld [vmem:[#allocation5 + $0x20] sm:$0xff]   ;;  %v887_v8 = vld [vmem:[#allocation7 + $0x10] sm:$0xff]   ;;  %s646_s11 = sshll.u32 %s1058_s30, 4  ;;  %s647_s11 = int_to_ptr.vmem [resolvable:$true] %s646_s11 }
  0x5c   :  { %748 = vmatpush3.bf16.msra.mxu0 %v877_v1  ;;  %768 = vmatpush3.bf16.msra.mxu1 %v885_v4  ;;  %v882_v9 = vld [vmem:[#allocation5 + $0x28] sm:$0xff]   ;;  %v888_v10 = vld [vmem:[#allocation7 + $0x18] sm:$0xff]   ;;  %v883_v11 = vld [vmem:[#allocation5 + $0x30] sm:$0xff]   ;;  %s1019_s12 = scalar_lea.vmem %s647_s11, 128  ;;  %p1024_p13 = scmp.lt.s32.totalorder %s647_s11, %s647_s11 }
  0x5d   :  { %749 = vmatprep.subr.bf16.mxu0 %v1056_v0  ;;  %769 = vmatprep.subr.bf16.mxu1 %v1056_v0  ;;  %v889_v12 = vld [vmem:[#allocation7 + $0x20] sm:$0xff]   ;;  %v884_v13 = vld [vmem:[#allocation5 + $0x38] sm:$0xff]   ;;  %v890_v15 = vld [vmem:[#allocation7 + $0x28] sm:$0xff]   ;;  %p1020_p12 = scmp.ne.s32.totalorder %s647_s11, %s1019_s12  ;;  %p1025_p0 = scmp.lt.s32.totalorder %s1019_s12, %s1019_s12 }
  0x5e   :  { %v100_v14 = vld [vmem:[#allocation2] sm:$0xff]  ;;  %v891_v17 = vld [vmem:[#allocation7 + $0x30] sm:$0xff]   ;;  %v893_v19 = vld [vmem:[#allocation8] sm:$0xff]  }
  0x5f   :  { %v101_v16 = vpack.c.bf16 %v100_v14, %v100_v14  ;;  %v892_v18 = vld [vmem:[#allocation7 + $0x38] sm:$0xff]   ;;  %v894_v20 = vld [vmem:[#allocation8 + $0x8] sm:$0xff]   ;;  %v895_v21 = vld [vmem:[#allocation8 + $0x10] sm:$0xff]   ;;  %p1026_p1 = por %p1025_p0, %p1024_p13 }
  0x60   :  { %750 = vmatpush3.bf16.msra.mxu0 %v878_v2  ;;  %770 = vmatpush3.bf16.msra.mxu1 %v886_v6  ;;  %v896_v22 = vld [vmem:[#allocation8 + $0x18] sm:$0xff]   ;;  %v897_v23 = vld [vmem:[#allocation8 + $0x20] sm:$0xff]   ;;  %v898_v24 = vld [vmem:[#allocation8 + $0x28] sm:$0xff]  }
  0x61   :  { %751 = vmatprep.subr.bf16.mxu0 %v1056_v0  ;;  %771 = vmatprep.subr.bf16.mxu1 %v1056_v0  ;;  %v657_v25 = vld [vmem:[%s1267_s2] ss:$0 sm:$0xff]  ;;  %v899_v33 = vld [vmem:[#allocation8 + $0x30] sm:$0xff]   ;;  %v901_v52 = vld [vmem:[#allocation10] sm:$0xff]   ;;  %p1027_p2 = pnand %p1026_p1, %p1020_p12 }
  0x62   :  { %v900_v34 = vld [vmem:[#allocation8 + $0x38] sm:$0xff]   ;;  %v902_v53 = vld [vmem:[#allocation10 + $0x8] sm:$0xff]   ;;  %v903_v54 = vld [vmem:[#allocation10 + $0x10] sm:$0xff]  }
  0x63   :  { %v666_v35 = vld [vmem:[%s1269_s4] ss:$0 sm:$0xff]  ;;  %v905_v56 = vld [vmem:[#allocation10 + $0x20] sm:$0xff]   ;;  %v906_v57 = vld [vmem:[#allocation10 + $0x28] sm:$0xff]  }
  0x64   :  { %752 = vmatpush3.bf16.msra.mxu0 %v879_v3  ;;  %772 = vmatpush3.bf16.msra.mxu1 %v887_v8  ;;  %v675_v43 = vld [vmem:[%s1271_s6] ss:$0 sm:$0xff]  ;;  %v907_v3 = vld [vmem:[#allocation10 + $0x30] sm:$0xff]  }
  0x65   :  { %753 = vmatprep.subr.bf16.mxu0 %v1056_v0  ;;  %773 = vmatprep.subr.bf16.mxu1 %v1056_v0  ;;  %v904_v55 = vld [vmem:[#allocation10 + $0x18] sm:$0xff]  }
  0x66   :  { %v908_v4 = vld [vmem:[#allocation10 + $0x38] sm:$0xff]  }
  0x68   :  { %754 = vmatpush3.bf16.msra.mxu0 %v880_v5  ;;  %774 = vmatpush3.bf16.msra.mxu1 %v888_v10 }
  0x69   :  { %755 = vmatprep.subr.bf16.mxu0 %v1056_v0  ;;  %775 = vmatprep.subr.bf16.mxu1 %v1056_v0 }
  0x6c   :  { %756 = vmatpush3.bf16.msra.mxu0 %v881_v7  ;;  %776 = vmatpush3.bf16.msra.mxu1 %v889_v12 }
  0x6d   :  { %757 = vmatprep.subr.bf16.mxu0 %v1056_v0  ;;  %777 = vmatprep.subr.bf16.mxu1 %v1056_v0 }
  0x70   :  { %758 = vmatpush3.bf16.msra.mxu0 %v882_v9  ;;  %778 = vmatpush3.bf16.msra.mxu1 %v890_v15 }
  0x71   :  { %759 = vmatprep.subr.bf16.mxu0 %v1056_v0  ;;  %779 = vmatprep.subr.bf16.mxu1 %v1056_v0 }
  0x74   :  { %760 = vmatpush3.bf16.msra.mxu0 %v883_v11  ;;  %780 = vmatpush3.bf16.msra.mxu1 %v891_v17 }
  0x75   :  { %761 = vmatprep.subr.bf16.mxu0 %v1056_v0  ;;  %781 = vmatprep.subr.bf16.mxu1 %v1056_v0 }
  0x78   :  { %762 = vmatpush3.bf16.msra.mxu0 %v884_v13  ;;  %782 = vmatpush3.bf16.msra.mxu1 %v892_v18  ;;  %v684_v13 = vld [vmem:[%s1273_s8] ss:$0 sm:$0xff] }
  0x79   :  { %787 = vmatprep.subr.bf16.mxu0 %v1056_v0  ;;  %807 = vmatprep.subr.bf16.mxu1 %v1056_v0 }
  0x7b   :  { %764 = vmatmul.mubr.bf16.vlgmr.msra.gmra.mrb[0].mxu0 %v101_v16 }
  0x7c   :  { %803 = vmatprep.mubr.msk.bf16.mxu0 %vm1057_vm0, %v1056_v0  ;;  %788 = vmatpush3.bf16.msra.mxu0 %v893_v19 }
  0x7d   :  { %789 = vmatprep.subr.bf16.mxu0 %v1056_v0 }
  0x80   :  { %790 = vmatpush3.bf16.msra.mxu0 %v894_v20 }
  0x81   :  { %791 = vmatprep.subr.bf16.mxu0 %v1056_v0 }
  0x84   :  { %792 = vmatpush3.bf16.msra.mxu0 %v895_v21 }
  0x85   :  { %793 = vmatprep.subr.bf16.mxu0 %v1056_v0 }
  0x88   :  { %794 = vmatpush3.bf16.msra.mxu0 %v896_v22 }
  0x89   :  { %795 = vmatprep.subr.bf16.mxu0 %v1056_v0 }
  0x8c   :  { %796 = vmatpush3.bf16.msra.mxu0 %v897_v23 }
  0x8d   :  { %797 = vmatprep.subr.bf16.mxu0 %v1056_v0 }
  0x90   :  { %798 = vmatpush3.bf16.msra.mxu0 %v898_v24 }
  0x91   :  { %799 = vmatprep.subr.bf16.mxu0 %v1056_v0 }
  0x94   :  { %800 = vmatpush3.bf16.msra.mxu0 %v899_v33 }
  0x95   :  { %801 = vmatprep.subr.bf16.mxu0 %v1056_v0 }
  0x98   :  { %802 = vmatpush3.bf16.msra.mxu0 %v900_v34 }
  0x99   :  { %827 = vmatprep.subr.bf16.mxu0 %v1056_v0 }
 0x14e   :  { %v207_v26 = vpop.f32.mrb[0].mxu0 }
 0x14f   :  { %v208_v27 = vadd.f32 %v657_v25, %v207_v26  ;;  %v765_v28 = vpop.f32.mrb[1].mxu0 }
 0x150   :  { %v210_v29 = vpop.f32.mrb[2].mxu0 }
 0x151   :  { %v213_v30 = vmax.f32 %v208_v27, 0.0  ;;  %v766_v31 = vpop.f32.mrb[3].mxu0 }
 0x153   :  { %v214_v32 = vpack.c.bf16 %v213_v30, %v213_v30 }
 0x155   :  { %784 = vmatmul.mubr.bf16.vlgmr.msra.gmra.mrb[0].mxu1 %v214_v32 }
 0x156   :  { %808 = vmatpush3.bf16.msra.mxu1 %v893_v19  ;;  %823 = vmatprep.mubr.msk.bf16.mxu1 %vm1057_vm0, %v1056_v0 }
 0x157   :  { %809 = vmatprep.subr.bf16.mxu1 %v1056_v0 }
 0x15a   :  { %810 = vmatpush3.bf16.msra.mxu1 %v894_v20 }
 0x15b   :  { %811 = vmatprep.subr.bf16.mxu1 %v1056_v0 }
 0x15e   :  { %812 = vmatpush3.bf16.msra.mxu1 %v895_v21 }
 0x15f   :  { %813 = vmatprep.subr.bf16.mxu1 %v1056_v0 }
 0x162   :  { %814 = vmatpush3.bf16.msra.mxu1 %v896_v22 }
 0x163   :  { %815 = vmatprep.subr.bf16.mxu1 %v1056_v0 }
 0x166   :  { %816 = vmatpush3.bf16.msra.mxu1 %v897_v23 }
 0x167   :  { %817 = vmatprep.subr.bf16.mxu1 %v1056_v0 }
 0x16a   :  { %818 = vmatpush3.bf16.msra.mxu1 %v898_v24 }
 0x16b   :  { %819 = vmatprep.subr.bf16.mxu1 %v1056_v0 }
 0x16e   :  { %820 = vmatpush3.bf16.msra.mxu1 %v899_v33 }
 0x16f   :  { %821 = vmatprep.subr.bf16.mxu1 %v1056_v0 }
 0x172   :  { %822 = vmatpush3.bf16.msra.mxu1 %v900_v34 }
 0x173   :  { %847 = vmatprep.subr.bf16.mxu1 %v1056_v0 }
 0x228   :  { %v320_v36 = vpop.f32.mrb[0].mxu1 }
 0x229   :  { %v321_v37 = vadd.f32 %v666_v35, %v320_v36  ;;  %v785_v38 = vpop.f32.mrb[1].mxu1 }
 0x22a   :  { %v323_v39 = vpop.f32.mrb[2].mxu1 }
 0x22b   :  { %v326_v40 = vmax.f32 %v321_v37, 0.0  ;;  %v786_v41 = vpop.f32.mrb[3].mxu1 }
 0x22d   :  { %v334_v42 = vpack.c.bf16 %v326_v40, %v326_v40 }
 0x22f   :  { %804 = vmatmul.mubr.bf16.vlgmr.msra.gmra.mrb[4].mxu0 %v334_v42 }
 0x230   :  { %828 = vmatpush3.bf16.msra.mxu0 %v893_v19  ;;  %843 = vmatprep.mubr.msk.bf16.mxu0 %vm1057_vm0, %v1056_v0 }
 0x231   :  { %829 = vmatprep.subr.bf16.mxu0 %v1056_v0 }
 0x234   :  { %830 = vmatpush3.bf16.msra.mxu0 %v894_v20 }
 0x235   :  { %831 = vmatprep.subr.bf16.mxu0 %v1056_v0 }
 0x238   :  { %832 = vmatpush3.bf16.msra.mxu0 %v895_v21 }
 0x239   :  { %833 = vmatprep.subr.bf16.mxu0 %v1056_v0 }
 0x23c   :  { %834 = vmatpush3.bf16.msra.mxu0 %v896_v22 }
 0x23d   :  { %835 = vmatprep.subr.bf16.mxu0 %v1056_v0 }
 0x240   :  { %836 = vmatpush3.bf16.msra.mxu0 %v897_v23 }
 0x241   :  { %837 = vmatprep.subr.bf16.mxu0 %v1056_v0 }
 0x244   :  { %838 = vmatpush3.bf16.msra.mxu0 %v898_v24 }
 0x245   :  { %839 = vmatprep.subr.bf16.mxu0 %v1056_v0 }
 0x248   :  { %840 = vmatpush3.bf16.msra.mxu0 %v899_v33 }
 0x249   :  { %841 = vmatprep.subr.bf16.mxu0 %v1056_v0 }
 0x24c   :  { %842 = vmatpush3.bf16.msra.mxu0 %v900_v34 }
 0x302   :  { %v433_v44 = vpop.f32.mrb[4].mxu0 }
 0x303   :  { %v434_v45 = vadd.f32 %v675_v43, %v433_v44  ;;  %v805_v46 = vpop.f32.mrb[5].mxu0 }
 0x304   :  { %v436_v47 = vpop.f32.mrb[6].mxu0 }
 0x305   :  { %v439_v48 = vmax.f32 %v434_v45, 0.0  ;;  %v806_v49 = vpop.f32.mrb[7].mxu0 }
 0x307   :  { %v440_v50 = vadd.f32 %v439_v48, %v326_v40 }
 0x309   :  { %v441_v51 = vpack.c.bf16 %v440_v50, %v440_v50 }
 0x30b   :  { %824 = vmatmul.mubr.bf16.vlgmr.msra.gmra.mrb[4].mxu1 %v441_v51 }
 0x30c   :  { %863 = vmatprep.mubr.msk.bf16.mxu1 %vm1057_vm0, %v1056_v0  ;;  %848 = vmatpush3.bf16.msra.mxu1 %v901_v52 }
 0x30d   :  { %849 = vmatprep.subr.bf16.mxu1 %v1056_v0 }
 0x310   :  { %850 = vmatpush3.bf16.msra.mxu1 %v902_v53 }
 0x311   :  { %851 = vmatprep.subr.bf16.mxu1 %v1056_v0 }
 0x314   :  { %852 = vmatpush3.bf16.msra.mxu1 %v903_v54 }
 0x315   :  { %853 = vmatprep.subr.bf16.mxu1 %v1056_v0 }
 0x318   :  { %854 = vmatpush3.bf16.msra.mxu1 %v904_v55 }
 0x319   :  { %855 = vmatprep.subr.bf16.mxu1 %v1056_v0 }
 0x31c   :  { %856 = vmatpush3.bf16.msra.mxu1 %v905_v56 }
 0x31d   :  { %857 = vmatprep.subr.bf16.mxu1 %v1056_v0 }
 0x320   :  { %858 = vmatpush3.bf16.msra.mxu1 %v906_v57 }
 0x321   :  { %859 = vmatprep.subr.bf16.mxu1 %v1056_v0 }
 0x324   :  { %860 = vmatpush3.bf16.msra.mxu1 %v907_v3 }
 0x325   :  { %861 = vmatprep.subr.bf16.mxu1 %v1056_v0 }
 0x328   :  { %862 = vmatpush3.bf16.msra.mxu1 %v908_v4 }
 0x3de   :  { %v476_v58 = vpop.f32.mrb[4].mxu1 }
 0x3df   :  { %v477_v59 = vadd.f32 %v675_v43, %v476_v58  ;;  %v825_v60 = vpop.f32.mrb[5].mxu1 }
 0x3e0   :  { %v479_v61 = vpop.f32.mrb[6].mxu1 }
 0x3e1   :  { %v482_v62 = vmax.f32 %v477_v59, 0.0  ;;  %v826_v63 = vpop.f32.mrb[7].mxu1 }
 0x3e3   :  { %v483_v1 = vadd.f32 %v482_v62, %v440_v50 }
 0x3e5   :  { %v484_v2 = vpack.c.bf16 %v483_v1, %v483_v1 }
 0x3e7   :  { %844 = vmatmul.mubr.bf16.vlgmr.msra.gmra.mrb[8].mxu0 %v484_v2 }
 0x4ba   :  { %v519_v5 = vpop.f32.mrb[8].mxu0 }
 0x4bb   :  { %v520_v6 = vadd.f32 %v675_v43, %v519_v5  ;;  %v845_v7 = vpop.f32.mrb[9].mxu0 }
 0x4bc   :  { %v522_v8 = vpop.f32.mrb[10].mxu0 }
 0x4bd   :  { %v525_v9 = vmax.f32 %v520_v6, 0.0  ;;  %v846_v10 = vpop.f32.mrb[11].mxu0 }
 0x4bf   :  { %v526_v11 = vadd.f32 %v525_v9, %v483_v1 }
 0x4c1   :  { %v527_v12 = vpack.c.bf16 %v526_v11, %v526_v11 }
 0x4c3   :  { %864 = vmatmul.mubr.bf16.vlgmr.msra.gmra.mrb[8].mxu1 %v527_v12 }
 0x596   :  { %v633_v14 = vpop.f32.mrb[8].mxu1 }
 0x597   :  { %v634_v15 = vadd.f32 %v684_v13, %v633_v14  ;;  %v865_v0 = vpop.f32.mrb[9].mxu1 }
 0x598   :  { %v636_v16 = vpop.f32.mrb[10].mxu1 }
 0x599   :  { %639 = vst [vmem:[#allocation11] sm:$0xff] %v634_v15  ;;  %v866_v17 = vpop.f32.mrb[11].mxu1 }
 0x59a   :  { %1030 = shalt.err (!%p1027_p2)
}
 0x59b   :  { %s1031_s8 = scalar_lea.hbm %s1274_s9, 128 }
 0x59c   :  { %p1032_p3 = scmp.ne.s32.totalorder %s1274_s9, %s1031_s8  ;;  %p1035_p4 = scmp.lt.u32.totalorder %s1031_s8, %s1274_s9 }
 0x59e   :  { %p1037_p5 = pnand %p1035_p4, %p1032_p3 }
 0x5a0   :  { %1040 = shalt.err (!%p1037_p5)
}
 0x5a1   :  { %649 = dma.vmem_to_hbm [thread:$0]  %s647_s11, 128, %s1274_s9, [#allocation4]  }
 0x5a2   :  { %1047 = dma.done.wait [#allocation4], 128  }
 0x5a3   :  { %1048 = vsyncadd [#allocation4], 4294967168 }
 0x5a4   :  { %653 = vsyncpa [#allocation3], 1 }
 0x5a5   :  { %654 = vsyncpa [#allocation6], 1 }
 0x5a6   :  { %655 = vsyncpa [#allocation9], 1 }
 0x5a7   :  { %656 = vsyncpa [#allocation4], 1 }

</bundles_post_ra>
